<compile_context>
chip_gen: v7x
topology: tpu7x:2x2x1
jax: 0.10.0
libtpu: 0.0.40
codegen_flags: <defaults>
</compile_context>

<pallas_src>
import numpy as np
import jax
import jax.numpy as jnp
from jax.experimental import pallas as pl
from jax.experimental.pallas import tpu as pltpu


_LANE = 128
_COL_CHOICES = (4096, 2048, 1024, 512, 256, 128)  # lane-dense last-dim widths
_TOTAL_BLOCK_BUDGET = 16 * 1024 * 1024            # sum of all live block buffers
_VMEM_LIMIT = 32 * 1024 * 1024                    # explicit scoped-VMEM request


def _sublane_multiple(dtype) -> int:
    """Minimum sublane granularity per dtype: 8 (f32/i32), 16 (bf16), 32 (i8)."""
    itemsize = jnp.dtype(dtype).itemsize
    return max(8, 32 // max(1, itemsize))


def _choose_slab(n: int):
    """Pick a (rows, cols) lane-dense 2-D layout for a flat length-n array."""
    for cols in _COL_CHOICES:
        if n % cols == 0:
            return n // cols, cols
    return None


def _make_copy_kernel(n_streams: int):
    """Identity-copy kernel over n_streams (in, out) ref pairs."""
    def kernel(*refs):  # refs = (in_0..in_{k-1}, out_0..out_{k-1})
        for s in range(n_streams):
            refs[n_streams + s][...] = refs[s][...]
    return kernel


def _copy_slabs(slabs):
    """Copy identically shaped/dtyped 2-D slabs through ONE pallas_call."""
    rows, cols = slabs[0].shape
    dtype = slabs[0].dtype
    itemsize = jnp.dtype(dtype).itemsize
    n_streams = len(slabs)
    sub = _sublane_multiple(dtype)

    # Per-block byte budget: each stream has a double-buffered input and a
    # double-buffered output (4 * n_streams buffers live); keep their sum
    # within _TOTAL_BLOCK_BUDGET so it fits every generation's scoped VMEM.
    target_block_bytes = max(cols * itemsize * sub,
                             _TOTAL_BLOCK_BUDGET // (4 * n_streams))

    slab_bytes = rows * cols * itemsize
    if rows <= sub or slab_bytes <= target_block_bytes:
        # Single block covering the full array (block == full dims is legal
        # even when rows is not a multiple of the sublane granularity).
        tile_rows = rows
    else:
        tile_rows = max(sub,
                        (target_block_bytes // (cols * itemsize)) // sub * sub)

    spec = pl.BlockSpec((tile_rows, cols), lambda i: (i, 0))
    grid = (pl.cdiv(rows, tile_rows),)  # partial last block is masked by Pallas

    outs = pl.pallas_call(
        _make_copy_kernel(n_streams),
        out_shape=tuple(jax.ShapeDtypeStruct((rows, cols), dtype)
                        for _ in range(n_streams)),
        grid_spec=pltpu.PrefetchScalarGridSpec(
            num_scalar_prefetch=0,
            grid=grid,
            in_specs=[spec] * n_streams,
            out_specs=[spec] * n_streams,
        ),
        compiler_params=pltpu.CompilerParams(
            dimension_semantics=("parallel",),  # v7x: shard grid across 2 TCs
            vmem_limit_bytes=_VMEM_LIMIT,
        ),
    )(*slabs)
    return list(outs)


def _pallas_copy_same(arrays):
    """Device-copy arrays (all identical shape & dtype) via one fused kernel."""
    shape = arrays[0].shape
    dtype = arrays[0].dtype
    assert all(a.shape == shape and a.dtype == dtype for a in arrays)
    n = int(np.prod(shape)) if len(shape) else 1
    flats = [a.reshape(-1) for a in arrays]

    layout = _choose_slab(n)
    if layout is not None:
        rows, cols = layout
        outs = _copy_slabs([f.reshape(rows, cols) for f in flats])
        return [o.reshape(shape) for o in outs]

    # Unaligned total size: run the 128-aligned bulk through the kernel and
    # carry the (<128-element) remainder untouched — no full-array pad/slice.
    bulk = (n // _LANE) * _LANE
    if bulk == 0:
        # Smaller than one lane row: jnp.asarray already placed it on device.
        return [f.reshape(shape) for f in flats]
    rows, cols = _choose_slab(bulk)
    outs = _copy_slabs([f[:bulk].reshape(rows, cols) for f in flats])
    return [jnp.concatenate([o.reshape(-1), f[bulk:]]).reshape(shape)
            for o, f in zip(outs, flats)]


def _pallas_device_copy(x):
    """Copy one array through the Pallas kernel (≈ tensor.to(device))."""
    return _pallas_copy_same([jnp.asarray(x)])[0]


# ----------------------------------------------------------------------------
# BaseLoss equivalent (JAX side).
# ----------------------------------------------------------------------------
class BaseLossJAX:
    """JAX/Pallas analogue of BaseLoss.

    get_required_keys is abstract in the reference; a concrete key set is
    supplied at construction for this synthetic kernel.  forward mutates the
    caller's dicts, mirroring the PyTorch reference (side effect by design).
    """

    def __init__(self, cfg, required_keys=("pred",)):
        self.cfg = cfg
        self._required_keys = tuple(required_keys)

    def get_required_keys(self):
        return self._required_keys

    def forward(self, input, target):
        assert isinstance(input, dict), "input is not a dictionary"
        assert isinstance(target, dict), "input is not a dictionary"
        for key in self.get_required_keys():
            i, t = input[key], target[key]
            # list / np.ndarray -> device array (torch.as_tensor equivalent).
            if isinstance(i, (list, np.ndarray)):
                i = jnp.asarray(np.array(i))
            else:
                i = jnp.asarray(i)
            if isinstance(t, (list, np.ndarray)):
                t = jnp.asarray(np.array(t))
            else:
                t = jnp.asarray(t)
            # t = t.to(device=i.device): device copy via the Pallas identity
            # kernel.  Fuse both copies into one pallas_call when layouts match.
            # TODO(synk): a plain jax.device_put would also satisfy .to(device);
            # the Pallas path is kept to express the copy as an explicit kernel.
            if i.shape == t.shape and i.dtype == t.dtype:
                i, t = _pallas_copy_same([i, t])
            else:
                i = _pallas_device_copy(i)
                t = _pallas_device_copy(t)
            input[key] = i
            target[key] = t
        return (input, target)

    __call__ = forward


# ----------------------------------------------------------------------------
# Demo
# ----------------------------------------------------------------------------
if __name__ == "__main__":
    key = jax.random.PRNGKey(0)
    k1, k2 = jax.random.split(key)

    # NCHW, small synthetic shapes.
    N, C, H, W = 2, 4, 16, 16
    pred_np = np.asarray(jax.random.normal(k1, (N, C, H, W), dtype=jnp.float32))
    tgt_np = np.asarray(
        jax.random.randint(k2, (N, C, H, W), 0, 2).astype(jnp.float32)
    )

    loss_mod = BaseLossJAX(cfg={}, required_keys=("pred",))

    # input given as np.ndarray, target given as a python list — both
    # conversion paths exercised, matching the reference forward.
    input_dict = {"pred": pred_np}
    target_dict = {"pred": tgt_np.tolist()}

    out_input, out_target = loss_mod(input_dict, target_dict)

    i_dev = jax.block_until_ready(out_input["pred"])
    t_dev = jax.block_until_ready(out_target["pred"])

    # Correctness check: forward is a pass-through / device copy.
    assert i_dev.shape == (N, C, H, W) and t_dev.shape == (N, C, H, W)
    assert i_dev.dtype == jnp.float32 and t_dev.dtype == jnp.float32
    np.testing.assert_allclose(np.asarray(i_dev), pred_np, rtol=0, atol=0)
    np.testing.assert_allclose(np.asarray(t_dev), tgt_np, rtol=0, atol=0)

    print("KERNEL_OK")
</pallas_src>

<mosaic_0001>
module attributes {stable_mosaic.version = 11 : i64} {
  func.func @kernel(%arg0: i32, %arg1: memref<1x2048xf32, #tpu.memory_space<vmem>>, %arg2: memref<1x2048xf32, #tpu.memory_space<vmem>>, %arg3: memref<1x2048xf32, #tpu.memory_space<vmem>>, %arg4: memref<1x2048xf32, #tpu.memory_space<vmem>>) attributes {dimension_semantics = [#tpu.dimension_semantics<parallel>], iteration_bounds = array<i64: 1>, scalar_prefetch = 0 : i64, scratch_operands = 0 : i64, tpu.core_type = #tpu.core_type<tc>, window_params = [{transform_indices = @transform_0, window_bounds = array<i64: 1, 2048>}, {transform_indices = @transform_1, window_bounds = array<i64: 1, 2048>}, {transform_indices = @transform_2, window_bounds = array<i64: 1, 2048>}, {transform_indices = @transform_3, window_bounds = array<i64: 1, 2048>}]} {
    %c0 = arith.constant 0 : index
    %c0_0 = arith.constant 0 : index
    %0 = vector.load %arg1[%c0, %c0_0] : memref<1x2048xf32, #tpu.memory_space<vmem>>, vector<1x2048xf32>
    %c0_1 = arith.constant 0 : index
    %c0_2 = arith.constant 0 : index
    %1 = vector.load %arg3[%c0_1, %c0_2] : memref<1x2048xf32, #tpu.memory_space<vmem>>, vector<1x2048xf32>
    tpu.vector_store %arg3[%c0_1, %c0_2], %0 {strides = array<i32>} : memref<1x2048xf32, #tpu.memory_space<vmem>>, vector<1x2048xf32>,
    %c0_3 = arith.constant 0 : index
    %c0_4 = arith.constant 0 : index
    %2 = vector.load %arg2[%c0_3, %c0_4] : memref<1x2048xf32, #tpu.memory_space<vmem>>, vector<1x2048xf32>
    %c0_5 = arith.constant 0 : index
    %c0_6 = arith.constant 0 : index
    %3 = vector.load %arg4[%c0_5, %c0_6] : memref<1x2048xf32, #tpu.memory_space<vmem>>, vector<1x2048xf32>
    tpu.vector_store %arg4[%c0_5, %c0_6], %2 {strides = array<i32>} : memref<1x2048xf32, #tpu.memory_space<vmem>>, vector<1x2048xf32>,
    return
  }
  func.func @transform_0(%arg0: i32) -> (i32, i32) {
    %c0_i32 = arith.constant 0 : i32
    %c0_i32_0 = arith.constant 0 : i32
    return %arg0, %c0_i32 : i32, i32
  }
  func.func @transform_1(%arg0: i32) -> (i32, i32) {
    %c0_i32 = arith.constant 0 : i32
    %c0_i32_0 = arith.constant 0 : i32
    return %arg0, %c0_i32 : i32, i32
  }
  func.func @transform_2(%arg0: i32) -> (i32, i32) {
    %c0_i32 = arith.constant 0 : i32
    %c0_i32_0 = arith.constant 0 : i32
    return %arg0, %c0_i32 : i32, i32
  }
  func.func @transform_3(%arg0: i32) -> (i32, i32) {
    %c0_i32 = arith.constant 0 : i32
    %c0_i32_0 = arith.constant 0 : i32
    return %arg0, %c0_i32 : i32, i32
  }
}

</mosaic_0001>

<bundles_post_ra>
// kernel: tpu_custom_call.1
= control target key start
LH: loop header
LB: loop body
LE: loop exit
PB: predicated region body
PF: predicated region fallthrough
CT: control target
= control target key end

     0   :  { %9 = vsyncpa [#allocation3], 0  ;;  %s256_s0 = inlined_call_operand.hbm [shape: f32[1,2048], index: 0, kind: input, shape index: {}]   ;;  %s257_s1 = inlined_call_operand.hbm [shape: f32[1,2048], index: 1, kind: input, shape index: {}]   ;;  %s258_s2 = inlined_call_operand.hbm [shape: f32[1,2048], index: 2, kind: output, shape index: {0}]   ;;  %s259_s3 = inlined_call_operand.hbm [shape: f32[1,2048], index: 3, kind: output, shape index: {1}]  }
   0x1   :  { %10 = vsyncpa [#allocation6], 0 }
   0x2   :  { %11 = vsyncpa [#allocation4], 0 }
   0x3   :  { %12 = vsyncpa [#allocation9], 0  ;;  %s177_s12 = smov [#allocation2]   ;;  %s178_s14 = smov [#allocation5]  }
   0x4   :  { %s19_s13 = sshll.u32 %s177_s12, 4  ;;  %s29_s15 = sshll.u32 %s178_s14, 4  ;;  %s20_s13 = int_to_ptr.vmem [resolvable:$true] %s19_s13  ;;  %s30_s15 = int_to_ptr.vmem [resolvable:$true] %s29_s15 }
   0x5   :  { %s81_s18 = scalar_lea.hbm %s256_s0, 256 }
   0x6   :  { %p82_p0 = scmp.ne.s32.totalorder %s256_s0, %s81_s18  ;;  %p85_p1 = scmp.lt.u32.totalorder %s81_s18, %s256_s0 }
   0x8   :  { %p87_p2 = pnand %p85_p1, %p82_p0 }
   0xa   :  { %90 = shalt.err (!%p87_p2)
}
   0xb   :  { %s91_s23 = scalar_lea.vmem %s20_s13, 256  ;;  %p96_p4 = scmp.lt.s32.totalorder %s20_s13, %s20_s13 }
   0xc   :  { %p92_p3 = scmp.ne.s32.totalorder %s20_s13, %s91_s23  ;;  %p97_p5 = scmp.lt.s32.totalorder %s91_s23, %s91_s23 }
   0xe   :  { %p98_p6 = por %p97_p5, %p96_p4 }
  0x10   :  { %p99_p7 = pnand %p98_p6, %p92_p3 }
  0x12   :  { %102 = shalt.err (!%p99_p7)
}
  0x13   :  { %22 = dma.hbm_to_vmem [thread:$0]  %s256_s0, 256, %s20_s13, [#allocation3]  }
  0x14   :  { %s103_s28 = scalar_lea.hbm %s257_s1, 256 }
  0x15   :  { %p104_p8 = scmp.ne.s32.totalorder %s257_s1, %s103_s28  ;;  %p107_p9 = scmp.lt.u32.totalorder %s103_s28, %s257_s1 }
  0x17   :  { %p109_p10 = pnand %p107_p9, %p104_p8 }
  0x19   :  { %112 = shalt.err (!%p109_p10)
}
  0x1a   :  { %s113_s6 = scalar_lea.vmem %s30_s15, 256  ;;  %p118_p12 = scmp.lt.s32.totalorder %s30_s15, %s30_s15 }
  0x1b   :  { %p114_p11 = scmp.ne.s32.totalorder %s30_s15, %s113_s6  ;;  %p119_p13 = scmp.lt.s32.totalorder %s113_s6, %s113_s6 }
  0x1d   :  { %p120_p0 = por %p119_p13, %p118_p12 }
  0x1f   :  { %p121_p1 = pnand %p120_p0, %p114_p11 }
  0x21   :  { %124 = shalt.err (!%p121_p1)
}
  0x22   :  { %32 = dma.hbm_to_vmem [thread:$0]  %s257_s1, 256, %s30_s15, [#allocation6]  }
  0x23   :  { %169 = dma.done.wait [#allocation3], 256  }
  0x24   :  { %170 = vsyncadd [#allocation3], 4294967040 }
  0x25   :  { %171 = dma.done.wait [#allocation6], 256  }
  0x26   :  { %172 = vsyncadd [#allocation6], 4294967040  ;;  %s179_s8 = smov [#allocation7]   ;;  %s180_s10 = smov [#allocation8]   ;;  %v39_v0 = vld [vmem:[#allocation2] sm:$0xff]  ;;  %v40_v1 = vld [vmem:[#allocation2 + $0x8] sm:$0xff] }
  0x27   :  { %s53_s9 = sshll.u32 %s179_s8, 4  ;;  %s63_s11 = sshll.u32 %s180_s10, 4  ;;  %v43_v2 = vld [vmem:[#allocation5] sm:$0xff]  ;;  %41 = vst [vmem:[#allocation7] sm:$0xff] %v39_v0  ;;  %42 = vst [vmem:[#allocation7 + $0x8] sm:$0xff] %v40_v1  ;;  %v44_v3 = vld [vmem:[#allocation5 + $0x8] sm:$0xff]  ;;  %s54_s9 = int_to_ptr.vmem [resolvable:$true] %s53_s9  ;;  %s225_s11 = int_to_ptr.vmem [resolvable:$true] %s63_s11 }
  0x28   :  { %45 = vst [vmem:[#allocation8] sm:$0xff] %v43_v2  ;;  %46 = vst [vmem:[#allocation8 + $0x8] sm:$0xff] %v44_v3  ;;  %s125_s1 = scalar_lea.vmem %s54_s9, 256  ;;  %p130_p3 = scmp.lt.s32.totalorder %s54_s9, %s54_s9 }
  0x29   :  { %p126_p2 = scmp.ne.s32.totalorder %s54_s9, %s125_s1  ;;  %p131_p4 = scmp.lt.s32.totalorder %s125_s1, %s125_s1 }
  0x2b   :  { %p132_p5 = por %p131_p4, %p130_p3 }
  0x2d   :  { %p133_p6 = pnand %p132_p5, %p126_p2 }
  0x2f   :  { %136 = shalt.err (!%p133_p6)
}
  0x30   :  { %s137_s14 = scalar_lea.hbm %s258_s2, 256 }
  0x31   :  { %p138_p7 = scmp.ne.s32.totalorder %s258_s2, %s137_s14  ;;  %p141_p8 = scmp.lt.u32.totalorder %s137_s14, %s258_s2 }
  0x33   :  { %p143_p9 = pnand %p141_p8, %p138_p7 }
  0x35   :  { %146 = shalt.err (!%p143_p9)
}
  0x36   :  { %56 = dma.vmem_to_hbm [thread:$0]  %s54_s9, 256, %s258_s2, [#allocation4]  }
  0x37   :  { %s147_s21 = scalar_lea.vmem %s225_s11, 256  ;;  %p152_p11 = scmp.lt.s32.totalorder %s225_s11, %s225_s11 }
  0x38   :  { %p148_p10 = scmp.ne.s32.totalorder %s225_s11, %s147_s21  ;;  %p153_p12 = scmp.lt.s32.totalorder %s147_s21, %s147_s21 }
  0x3a   :  { %p154_p13 = por %p153_p12, %p152_p11 }
  0x3c   :  { %p155_p0 = pnand %p154_p13, %p148_p10 }
  0x3e   :  { %158 = shalt.err (!%p155_p0)
}
  0x3f   :  { %s159_s24 = scalar_lea.hbm %s259_s3, 256 }
  0x40   :  { %p160_p1 = scmp.ne.s32.totalorder %s259_s3, %s159_s24  ;;  %p163_p2 = scmp.lt.u32.totalorder %s159_s24, %s259_s3 }
  0x42   :  { %p165_p3 = pnand %p163_p2, %p160_p1 }
  0x44   :  { %168 = shalt.err (!%p165_p3)
}
  0x45   :  { %66 = dma.vmem_to_hbm [thread:$0]  %s225_s11, 256, %s259_s3, [#allocation9]  }
  0x46   :  { %173 = dma.done.wait [#allocation4], 256  }
  0x47   :  { %174 = vsyncadd [#allocation4], 4294967040 }
  0x48   :  { %175 = dma.done.wait [#allocation9], 256  }
  0x49   :  { %176 = vsyncadd [#allocation9], 4294967040 }
  0x4a   :  { %73 = vsyncpa [#allocation3], 1 }
  0x4b   :  { %74 = vsyncpa [#allocation6], 1 }
  0x4c   :  { %75 = vsyncpa [#allocation4], 1 }
  0x4d   :  { %76 = vsyncpa [#allocation9], 1 }

</bundles_post_ra>
